<compile_context>
chip_gen: v6e
topology: v6e:2x2x1
jax: 0.10.0
libtpu: 0.0.40
codegen_flags: <defaults>
</compile_context>

<pallas_src>
import jax
import jax.numpy as jnp
from jax.experimental import pallas as pl
from jax.experimental.pallas import tpu as pltpu


LN_EPS = 1e-5


def _round_up(x, m):
    return ((x + m - 1) // m) * m


def dpr_head_kernel(emb_ref, w_ref, wp_ref, bp_ref, gamma_ref, beta_ref,
                    wl_ref, bl_ref, out_ref, acc_ref):
    """Streams (TB, TS, H) embedding tiles, accumulates the masked mean in an
    f32 VMEM accumulator, and runs pooler + LayerNorm + Linear once per batch
    tile in the s==last epilogue."""
    s = pl.program_id(1)

    @pl.when(s == 0)
    def _init():
        acc_ref[...] = jnp.zeros_like(acc_ref)

    # ---- weighted (masked-mean) partial reduction over this seq tile ------
    # emb is stored/streamed in bf16; cast to f32 for the VPU reduction and
    # accumulate in f32.  w_ref is the transposed (TS, TB) lane-dense weight
    # tile with 1/denom already folded in.
    emb = emb_ref[...].astype(jnp.float32)              # (TB, TS, H)
    w = w_ref[...].T                                    # (TS, TB) -> (TB, TS)
    acc_ref[...] += jnp.sum(emb * w[:, :, None], axis=1)

    # ---- epilogue: pooler + LayerNorm + (eval) Dropout + Linear ------------
    @pl.when(s == pl.num_programs(1) - 1)
    def _epilogue():
        hidden = acc_ref[...]                            # (TB, H) f32 masked mean

        # BERT-style pooler: tanh(hidden @ W_pool + b_pool); bf16 MXU operands,
        # f32 accumulation.
        pooled = jnp.tanh(
            jnp.dot(hidden.astype(jnp.bfloat16), wp_ref[...],
                    preferred_element_type=jnp.float32) + bp_ref[...])

        # LayerNorm over the hidden dim (f32 VPU math).
        mean = jnp.mean(pooled, axis=-1, keepdims=True)
        centered = pooled - mean
        var = jnp.mean(centered * centered, axis=-1, keepdims=True)
        ln = (centered * jax.lax.rsqrt(var + LN_EPS)
              * gamma_ref[...] + beta_ref[...])

        # Dropout in eval mode == identity.
        # TODO(synk): training-mode dropout (pltpu.prng_*) not emitted; module
        # semantics here match model.eval().
        out_ref[...] = (
            jnp.dot(ln.astype(jnp.bfloat16), wl_ref[...],
                    preferred_element_type=jnp.float32) + bl_ref[...]
        ).astype(out_ref.dtype)


def _choose_tiles(B, S, H):
    # Batch tile: multiple of 8 (sublane), capped at 128 (MXU M dimension).
    TB = min(128, _round_up(B, 8))
    # Sequence tile: keep the bf16 emb double-buffer (2 bufs x TB*TS*H*2B)
    # under ~16 MiB so the whole pipeline fits scoped VMEM on v5e/v6e/v7x.
    emb_budget_bytes = 16 * 1024 * 1024
    ts_budget = emb_budget_bytes // (2 * 2 * TB * H)
    ts_budget = max(8, (ts_budget // 8) * 8)
    TS = min(_round_up(S, 8), 128, ts_budget)
    return TB, TS


def dpr_context_encoder_forward(input_ids, attention_mask, params):
    """input_ids, attention_mask: (B, S) int32.  Returns (B, H) float32."""
    B, S = input_ids.shape
    H = params["embedding"].shape[1]

    TB, TS = _choose_tiles(B, S, H)
    B_pad = _round_up(B, TB)
    S_pad = _round_up(S, TS)
    nb, ns = B_pad // TB, S_pad // TS

    # --- glue (plain JAX) ----------------------------------------------------
    ids_p = jnp.pad(input_ids, ((0, B_pad - B), (0, S_pad - S)))
    mask_f = attention_mask.astype(jnp.float32)                  # (B, S)
    denom = jnp.maximum(jnp.sum(mask_f, axis=1, keepdims=True), 1.0)
    # Pre-fold 1/denom into per-token weights; store transposed (S_pad, B_pad)
    # so the per-tile block (TS, TB) is lane-dense and (8,128)-legal.
    w_t = jnp.pad(mask_f / denom, ((0, B_pad - B), (0, S_pad - S))).T
    # Embedding gather stays in XLA; the table is bf16 so the dominant
    # (B, S, H) stream moves half the HBM bytes.
    # TODO(synk): fuse the gather into the kernel (scalar-prefetched ids +
    # per-row DMA) to remove the HBM write+re-read of this intermediate.
    emb = params["embedding"][ids_p]                             # bf16 (B_pad, S_pad, H)

    wp = params["w_pool"].astype(jnp.bfloat16)
    wl = params["w_linear"].astype(jnp.bfloat16)

    const2d = lambda shape: pl.BlockSpec(shape, lambda i, s: (0, 0))

    out = pl.pallas_call(
        dpr_head_kernel,
        out_shape=jax.ShapeDtypeStruct((B_pad, H), jnp.float32),
        grid_spec=pltpu.PrefetchScalarGridSpec(
            num_scalar_prefetch=0,
            grid=(nb, ns),
            in_specs=[
                pl.BlockSpec((TB, TS, H), lambda i, s: (i, s, 0)),   # emb stream
                pl.BlockSpec((TS, TB), lambda i, s: (s, i)),         # mask weights^T
                const2d((H, H)),                                     # W_pool (bf16)
                const2d((1, H)),                                     # b_pool
                const2d((1, H)),                                     # LN gamma
                const2d((1, H)),                                     # LN beta
                const2d((H, H)),                                     # W_linear (bf16)
                const2d((1, H)),                                     # b_linear
            ],
            out_specs=pl.BlockSpec((TB, H), lambda i, s: (i, 0)),
            scratch_shapes=[pltpu.VMEM((TB, H), jnp.float32)],
        ),
        compiler_params=pltpu.CompilerParams(
            dimension_semantics=("parallel", "arbitrary"),
            vmem_limit_bytes=32 * 1024 * 1024,
        ),
    )(emb, w_t,
      wp, params["b_pool"],
      params["ln_gamma"], params["ln_beta"],
      wl, params["b_linear"])

    return out[:B]


def init_params(key, vocab_size, hidden_size):
    ks = jax.random.split(key, 5)
    scale = 1.0 / jnp.sqrt(hidden_size)
    return {
        # bf16 table: halves HBM traffic of the gathered (B, S, H) stream.
        "embedding": (jax.random.normal(ks[0], (vocab_size, hidden_size),
                                        jnp.float32) * 0.02).astype(jnp.bfloat16),
        "w_pool": jax.random.uniform(ks[1], (hidden_size, hidden_size),
                                     jnp.float32, -scale, scale),
        "b_pool": jnp.zeros((1, hidden_size), jnp.float32),
        # nn.LayerNorm defaults: weight=1, bias=0
        "ln_gamma": jnp.ones((1, hidden_size), jnp.float32),
        "ln_beta": jnp.zeros((1, hidden_size), jnp.float32),
        "w_linear": jax.random.uniform(ks[2], (hidden_size, hidden_size),
                                       jnp.float32, -scale, scale),
        "b_linear": jax.random.uniform(ks[3], (1, hidden_size),
                                       jnp.float32, -scale, scale),
    }


if __name__ == "__main__":
    B, S, H, V = 2, 8, 32, 64
    key = jax.random.PRNGKey(0)
    k_param, k_ids, k_len = jax.random.split(key, 3)

    params = init_params(k_param, V, H)
    input_ids = jax.random.randint(k_ids, (B, S), 0, V, dtype=jnp.int32)
    # deterministic ragged attention mask (first row full, second row half)
    attention_mask = jnp.array(
        [[1] * S, [1] * (S // 2) + [0] * (S - S // 2)], dtype=jnp.int32)

    out = dpr_context_encoder_forward(input_ids, attention_mask, params)
    out = jax.block_until_ready(out)
    assert out.shape == (B, H) and out.dtype == jnp.float32
    assert bool(jnp.all(jnp.isfinite(out)))
    print("KERNEL_OK")
</pallas_src>

<mosaic_0001>
module attributes {stable_mosaic.version = 11 : i64} {
  func.func @dpr_head_kernel(%arg0: i32, %arg1: i32, %arg2: memref<8x8x32xbf16, #tpu.memory_space<vmem>>, %arg3: memref<8x8xf32, #tpu.memory_space<vmem>>, %arg4: memref<32x32xbf16, #tpu.memory_space<vmem>>, %arg5: memref<1x32xf32, #tpu.memory_space<vmem>>, %arg6: memref<1x32xf32, #tpu.memory_space<vmem>>, %arg7: memref<1x32xf32, #tpu.memory_space<vmem>>, %arg8: memref<32x32xbf16, #tpu.memory_space<vmem>>, %arg9: memref<1x32xf32, #tpu.memory_space<vmem>>, %arg10: memref<8x32xf32, #tpu.memory_space<vmem>>, %arg11: memref<8x32xf32, #tpu.memory_space<vmem>>) attributes {dimension_semantics = [#tpu.dimension_semantics<parallel>, #tpu.dimension_semantics<arbitrary>], iteration_bounds = array<i64: 1, 1>, scalar_prefetch = 0 : i64, scratch_operands = 1 : i64, tpu.core_type = #tpu.core_type<tc>, window_params = [{transform_indices = @transform_0, window_bounds = array<i64: 8, 8, 32>}, {transform_indices = @transform_1, window_bounds = array<i64: 8, 8>}, {pipeline_mode = #tpu.pipeline_mode<synchronous>, transform_indices = @transform_2, window_bounds = array<i64: 32, 32>}, {pipeline_mode = #tpu.pipeline_mode<synchronous>, transform_indices = @transform_3, window_bounds = array<i64: 1, 32>}, {pipeline_mode = #tpu.pipeline_mode<synchronous>, transform_indices = @transform_4, window_bounds = array<i64: 1, 32>}, {pipeline_mode = #tpu.pipeline_mode<synchronous>, transform_indices = @transform_5, window_bounds = array<i64: 1, 32>}, {pipeline_mode = #tpu.pipeline_mode<synchronous>, transform_indices = @transform_6, window_bounds = array<i64: 32, 32>}, {pipeline_mode = #tpu.pipeline_mode<synchronous>, transform_indices = @transform_7, window_bounds = array<i64: 1, 32>}, {transform_indices = @transform_8, window_bounds = array<i64: 8, 32>}]} {
    %c0_i32 = arith.constant 0 : i32
    %0 = arith.cmpi eq, %arg1, %c0_i32 : i32
    %1 = arith.extui %0 : i1 to i32
    %c0_i32_0 = arith.constant 0 : i32
    %2 = arith.cmpi ne, %1, %c0_i32_0 : i32
    scf.if %2 {
      %cst_11 = arith.constant 0.000000e+00 : f32
      %17 = vector.broadcast %cst_11 : f32 to vector<8x32xf32>
      %c0_12 = arith.constant 0 : index
      %c0_13 = arith.constant 0 : index
      %18 = vector.load %arg11[%c0_12, %c0_13] : memref<8x32xf32, #tpu.memory_space<vmem>>, vector<8x32xf32>
      tpu.vector_store %arg11[%c0_12, %c0_13], %17 {strides = array<i32>} : memref<8x32xf32, #tpu.memory_space<vmem>>, vector<8x32xf32>,
    } else {
    }
    %c0 = arith.constant 0 : index
    %c0_1 = arith.constant 0 : index
    %c0_2 = arith.constant 0 : index
    %3 = vector.load %arg2[%c0, %c0_1, %c0_2] : memref<8x8x32xbf16, #tpu.memory_space<vmem>>, vector<8x8x32xbf16>
    %4 = arith.extf %3 : vector<8x8x32xbf16> to vector<8x8x32xf32>
    %c0_3 = arith.constant 0 : index
    %c0_4 = arith.constant 0 : index
    %5 = vector.load %arg3[%c0_3, %c0_4] : memref<8x8xf32, #tpu.memory_space<vmem>>, vector<8x8xf32>
    %6 = tpu.transpose %5, [1, 0] : vector<8x8xf32> -> vector<8x8xf32>
    %c0_5 = arith.constant 0 : index
    %c0_6 = arith.constant 0 : index
    %7 = vector.load %arg11[%c0_5, %c0_6] : memref<8x32xf32, #tpu.memory_space<vmem>>, vector<8x32xf32>
    %8 = vector.shape_cast %6 : vector<8x8xf32> to vector<8x8x1xf32>
    %9 = vector.broadcast %8 : vector<8x8x1xf32> to vector<8x8x32xf32>
    %10 = arith.mulf %4, %9 : vector<8x8x32xf32>
    %cst = arith.constant dense<0.000000e+00> : vector<8x32xf32>
    %11 = vector.multi_reduction <add>, %10, %cst [1] : vector<8x8x32xf32> to vector<8x32xf32>
    %12 = arith.addf %7, %11 : vector<8x32xf32>
    %c0_7 = arith.constant 0 : index
    %c0_8 = arith.constant 0 : index
    %13 = vector.load %arg11[%c0_7, %c0_8] : memref<8x32xf32, #tpu.memory_space<vmem>>, vector<8x32xf32>
    tpu.vector_store %arg11[%c0_7, %c0_8], %12 {strides = array<i32>} : memref<8x32xf32, #tpu.memory_space<vmem>>, vector<8x32xf32>,
    %c0_i32_9 = arith.constant 0 : i32
    %14 = arith.cmpi eq, %arg1, %c0_i32_9 : i32
    %15 = arith.extui %14 : i1 to i32
    %c0_i32_10 = arith.constant 0 : i32
    %16 = arith.cmpi ne, %15, %c0_i32_10 : i32
    scf.if %16 {
      %c0_11 = arith.constant 0 : index
      %c0_12 = arith.constant 0 : index
      %17 = vector.load %arg11[%c0_11, %c0_12] : memref<8x32xf32, #tpu.memory_space<vmem>>, vector<8x32xf32>
      %18 = arith.truncf %17 : vector<8x32xf32> to vector<8x32xbf16>
      %c0_13 = arith.constant 0 : index
      %c0_14 = arith.constant 0 : index
      %19 = vector.load %arg4[%c0_13, %c0_14] : memref<32x32xbf16, #tpu.memory_space<vmem>>, vector<32x32xbf16>
      %cst_15 = arith.constant dense<0.000000e+00> : vector<8x32xf32>
      %20 = tpu.matmul %18, %19, %cst_15 {dimension_numbers = #tpu.dot_dimension_numbers<[1], [0], [0], [1], [0, 0, 1, 1], [], []>} : vector<8x32xbf16>, vector<32x32xbf16>, vector<8x32xf32> -> vector<8x32xf32>
      %c0_16 = arith.constant 0 : index
      %c0_17 = arith.constant 0 : index
      %21 = vector.load %arg5[%c0_16, %c0_17] : memref<1x32xf32, #tpu.memory_space<vmem>>, vector<1x32xf32>
      %22 = vector.broadcast %21 : vector<1x32xf32> to vector<8x32xf32>
      %23 = arith.addf %20, %22 : vector<8x32xf32>
      %24 = math.tanh %23 : vector<8x32xf32>
      %cst_18 = arith.constant dense<0.000000e+00> : vector<8xf32>
      %25 = vector.multi_reduction <add>, %24, %cst_18 [1] : vector<8x32xf32> to vector<8xf32>
      %26 = vector.shape_cast %25 : vector<8xf32> to vector<8x1xf32>
      %cst_19 = arith.constant 3.200000e+01 : f32
      %27 = vector.broadcast %cst_19 : f32 to vector<8x1xf32>
      %28 = arith.divf %26, %27 : vector<8x1xf32>
      %29 = vector.broadcast %28 : vector<8x1xf32> to vector<8x32xf32>
      %30 = arith.subf %24, %29 : vector<8x32xf32>
      %31 = arith.mulf %30, %30 : vector<8x32xf32>
      %cst_20 = arith.constant dense<0.000000e+00> : vector<8xf32>
      %32 = vector.multi_reduction <add>, %31, %cst_20 [1] : vector<8x32xf32> to vector<8xf32>
      %33 = vector.shape_cast %32 : vector<8xf32> to vector<8x1xf32>
      %cst_21 = arith.constant 3.200000e+01 : f32
      %34 = vector.broadcast %cst_21 : f32 to vector<8x1xf32>
      %35 = arith.divf %33, %34 : vector<8x1xf32>
      %cst_22 = arith.constant 9.99999974E-6 : f32
      %36 = vector.broadcast %cst_22 : f32 to vector<8x1xf32>
      %37 = arith.addf %35, %36 : vector<8x1xf32>
      %38 = math.rsqrt %37 : vector<8x1xf32>
      %39 = vector.broadcast %38 : vector<8x1xf32> to vector<8x32xf32>
      %40 = arith.mulf %30, %39 : vector<8x32xf32>
      %c0_23 = arith.constant 0 : index
      %c0_24 = arith.constant 0 : index
      %41 = vector.load %arg6[%c0_23, %c0_24] : memref<1x32xf32, #tpu.memory_space<vmem>>, vector<1x32xf32>
      %42 = vector.broadcast %41 : vector<1x32xf32> to vector<8x32xf32>
      %43 = arith.mulf %40, %42 : vector<8x32xf32>
      %c0_25 = arith.constant 0 : index
      %c0_26 = arith.constant 0 : index
      %44 = vector.load %arg7[%c0_25, %c0_26] : memref<1x32xf32, #tpu.memory_space<vmem>>, vector<1x32xf32>
      %45 = vector.broadcast %44 : vector<1x32xf32> to vector<8x32xf32>
      %46 = arith.addf %43, %45 : vector<8x32xf32>
      %47 = arith.truncf %46 : vector<8x32xf32> to vector<8x32xbf16>
      %c0_27 = arith.constant 0 : index
      %c0_28 = arith.constant 0 : index
      %48 = vector.load %arg8[%c0_27, %c0_28] : memref<32x32xbf16, #tpu.memory_space<vmem>>, vector<32x32xbf16>
      %cst_29 = arith.constant dense<0.000000e+00> : vector<8x32xf32>
      %49 = tpu.matmul %47, %48, %cst_29 {dimension_numbers = #tpu.dot_dimension_numbers<[1], [0], [0], [1], [0, 0, 1, 1], [], []>} : vector<8x32xbf16>, vector<32x32xbf16>, vector<8x32xf32> -> vector<8x32xf32>
      %c0_30 = arith.constant 0 : index
      %c0_31 = arith.constant 0 : index
      %50 = vector.load %arg9[%c0_30, %c0_31] : memref<1x32xf32, #tpu.memory_space<vmem>>, vector<1x32xf32>
      %51 = vector.broadcast %50 : vector<1x32xf32> to vector<8x32xf32>
      %52 = arith.addf %49, %51 : vector<8x32xf32>
      %c0_32 = arith.constant 0 : index
      %c0_33 = arith.constant 0 : index
      %53 = vector.load %arg10[%c0_32, %c0_33] : memref<8x32xf32, #tpu.memory_space<vmem>>, vector<8x32xf32>
      tpu.vector_store %arg10[%c0_32, %c0_33], %52 {strides = array<i32>} : memref<8x32xf32, #tpu.memory_space<vmem>>, vector<8x32xf32>,
    } else {
    }
    return
  }
  func.func @transform_0(%arg0: i32, %arg1: i32) -> (i32, i32, i32) {
    %c0_i32 = arith.constant 0 : i32
    %c0_i32_0 = arith.constant 0 : i32
    return %arg0, %arg1, %c0_i32 : i32, i32, i32
  }
  func.func @transform_1(%arg0: i32, %arg1: i32) -> (i32, i32) {
    %c0_i32 = arith.constant 0 : i32
    return %arg1, %arg0 : i32, i32
  }
  func.func @transform_2(%arg0: i32, %arg1: i32) -> (i32, i32) {
    %c0_i32 = arith.constant 0 : i32
    %c0_i32_0 = arith.constant 0 : i32
    %c0_i32_1 = arith.constant 0 : i32
    return %c0_i32, %c0_i32_0 : i32, i32
  }
  func.func @transform_3(%arg0: i32, %arg1: i32) -> (i32, i32) {
    %c0_i32 = arith.constant 0 : i32
    %c0_i32_0 = arith.constant 0 : i32
    %c0_i32_1 = arith.constant 0 : i32
    return %c0_i32, %c0_i32_0 : i32, i32
  }
  func.func @transform_4(%arg0: i32, %arg1: i32) -> (i32, i32) {
    %c0_i32 = arith.constant 0 : i32
    %c0_i32_0 = arith.constant 0 : i32
    %c0_i32_1 = arith.constant 0 : i32
    return %c0_i32, %c0_i32_0 : i32, i32
  }
  func.func @transform_5(%arg0: i32, %arg1: i32) -> (i32, i32) {
    %c0_i32 = arith.constant 0 : i32
    %c0_i32_0 = arith.constant 0 : i32
    %c0_i32_1 = arith.constant 0 : i32
    return %c0_i32, %c0_i32_0 : i32, i32
  }
  func.func @transform_6(%arg0: i32, %arg1: i32) -> (i32, i32) {
    %c0_i32 = arith.constant 0 : i32
    %c0_i32_0 = arith.constant 0 : i32
    %c0_i32_1 = arith.constant 0 : i32
    return %c0_i32, %c0_i32_0 : i32, i32
  }
  func.func @transform_7(%arg0: i32, %arg1: i32) -> (i32, i32) {
    %c0_i32 = arith.constant 0 : i32
    %c0_i32_0 = arith.constant 0 : i32
    %c0_i32_1 = arith.constant 0 : i32
    return %c0_i32, %c0_i32_0 : i32, i32
  }
  func.func @transform_8(%arg0: i32, %arg1: i32) -> (i32, i32) {
    %c0_i32 = arith.constant 0 : i32
    %c0_i32_0 = arith.constant 0 : i32
    return %arg0, %c0_i32 : i32, i32
  }
}

</mosaic_0001>

<bundles_post_ra>
// kernel: tpu_custom_call.1
= control target key start
LH: loop header
LB: loop body
LE: loop exit
PB: predicated region body
PF: predicated region fallthrough
CT: control target
= control target key end

     0   :  { %13 = vsyncpa [#allocation4], 0  ;;  %s752_s0 = inlined_call_operand.hbm [shape: bf16[8,8,32], index: 0, kind: input, shape index: {}]   ;;  %s753_s1 = inlined_call_operand.hbm [shape: f32[8,8], index: 1, kind: input, shape index: {}]   ;;  %s754_s2 = inlined_call_operand.hbm [shape: bf16[32,32], index: 2, kind: input, shape index: {}]   ;;  %s755_s3 = inlined_call_operand.vmem [shape: f32[1,32], index: 3, kind: input, shape index: {}]   ;;  %s756_s4 = inlined_call_operand.vmem [shape: f32[1,32], index: 4, kind: input, shape index: {}]   ;;  %s757_s5 = inlined_call_operand.vmem [shape: f32[1,32], index: 5, kind: input, shape index: {}]   ;;  %s758_s6 = inlined_call_operand.hbm [shape: bf16[32,32], index: 6, kind: input, shape index: {}]   ;;  %s759_s7 = inlined_call_operand.vmem [shape: f32[1,32], index: 7, kind: input, shape index: {}]   ;;  %s760_s8 = inlined_call_operand.hbm [shape: f32[8,32], index: 8, kind: output, shape index: {}]  }
   0x1   :  { %14 = vsyncpa [#allocation7], 0 }
   0x2   :  { %15 = vsyncpa [#allocation10], 0 }
   0x3   :  { %16 = vsyncpa [#allocation5], 0  ;;  %s649_s27 = smov [#allocation6]   ;;  %s650_s29 = smov [#allocation3]  }
   0x4   :  { %s35_s28 = sshll.u32 %s649_s27, 4  ;;  %s22_s30 = sshll.u32 %s650_s29, 4  ;;  %s36_s28 = int_to_ptr.vmem [resolvable:$true] %s35_s28  ;;  %s23_s30 = int_to_ptr.vmem [resolvable:$true] %s22_s30 }
   0x5   :  { %s549_s9 = scalar_lea.vmem %s36_s28, 128  ;;  %p554_p1 = scmp.lt.s32.totalorder %s36_s28, %s36_s28 }
   0x6   :  { %p550_p0 = scmp.ne.s32.totalorder %s36_s28, %s549_s9  ;;  %p555_p2 = scmp.lt.s32.totalorder %s549_s9, %s549_s9 }
   0x8   :  { %p556_p3 = por %p555_p2, %p554_p1 }
   0xa   :  { %p557_p4 = pnand %p556_p3, %p550_p0 }
   0xc   :  { %560 = shalt.err (!%p557_p4)
}
   0xd   :  { %38 = dma.hbm_to_vmem [thread:$0]  %s753_s1, 128, %s36_s28, [#allocation7]  }
   0xe   :  { %s569_s12 = scalar_lea.vmem %s23_s30, 512  ;;  %p574_p6 = scmp.lt.s32.totalorder %s23_s30, %s23_s30 }
   0xf   :  { %p570_p5 = scmp.ne.s32.totalorder %s23_s30, %s569_s12  ;;  %p575_p7 = scmp.lt.s32.totalorder %s569_s12, %s569_s12 }
  0x11   :  { %p576_p8 = por %p575_p7, %p574_p6 }
  0x13   :  { %p577_p9 = pnand %p576_p8, %p570_p5 }
  0x15   :  { %580 = shalt.err (!%p577_p9)
}
  0x16   :  { %s651_s13 = smov 64   ;;  %s652_s14 = smov 4  }
  0x17   :  { %28 = dma.hbm_to_vmem [thread:$0]  %s752_s0, 512, %s23_s30, [#allocation4], %s651_s13, %s651_s13, %s652_s14  }
  0x18   :  { %s653_s17 = smov [#allocation8]   ;;  %s654_s19 = smov [#allocation9]  }
  0x19   :  { %s44_s18 = sshll.u32 %s653_s17, 4  ;;  %s62_s20 = sshll.u32 %s654_s19, 4  ;;  %s45_s18 = int_to_ptr.vmem [resolvable:$true] %s44_s18  ;;  %s63_s20 = int_to_ptr.vmem [resolvable:$true] %s62_s20 }
  0x1a   :  { %s589_s1 = scalar_lea.vmem %s45_s18, 256  ;;  %p594_p11 = scmp.lt.s32.totalorder %s45_s18, %s45_s18 }
  0x1b   :  { %p590_p10 = scmp.ne.s32.totalorder %s45_s18, %s589_s1  ;;  %p595_p12 = scmp.lt.s32.totalorder %s589_s1, %s589_s1 }
  0x1d   :  { %p596_p13 = por %p595_p12, %p594_p11 }
  0x1f   :  { %p597_p0 = pnand %p596_p13, %p590_p10 }
  0x21   :  { %600 = shalt.err (!%p597_p0)
}
  0x22   :  { %50 = dma.hbm_to_vmem [thread:$0]  %s754_s2, 256, %s45_s18, [#allocation7], %s651_s13, %s651_s13, %s652_s14  }
  0x23   :  { %s609_s23 = scalar_lea.vmem %s63_s20, 256  ;;  %p614_p2 = scmp.lt.s32.totalorder %s63_s20, %s63_s20 }
  0x24   :  { %p610_p1 = scmp.ne.s32.totalorder %s63_s20, %s609_s23  ;;  %p615_p3 = scmp.lt.s32.totalorder %s609_s23, %s609_s23 }
  0x26   :  { %p616_p4 = por %p615_p3, %p614_p2 }
  0x28   :  { %p617_p5 = pnand %p616_p4, %p610_p1 }
  0x2a   :  { %620 = shalt.err (!%p617_p5)
}
  0x2b   :  { %68 = dma.hbm_to_vmem [thread:$0]  %s758_s6, 256, %s63_s20, [#allocation10], %s651_s13, %s651_s13, %s652_s14  }
  0x2c   :  { %641 = dma.done.wait [#allocation4], 512  }
  0x2d   :  { %642 = vsyncadd [#allocation4], 4294966784 }
  0x2e   :  { %643 = dma.done.wait [#allocation7], 384  }
  0x2f   :  { %644 = vsyncadd [#allocation7], 4294966912 }
  0x30   :  { %645 = dma.done.wait [#allocation10], 256  }
  0x31   :  { %646 = vsyncadd [#allocation10], 4294967040  ;;  %v106_v0 = vld [vmem:[#allocation6] sm:$0xff]  ;;  %v140_v1 = vlaneseq  ;;  %vm88_vm0 = vcmask 261120   ;;  %v655_v19 = vmov 0.0   ;;  %v533_v21 = vld [vmem:[#allocation8 + $0x8] sm:$0xff]  }
  0x32   :  { %107 = vxpose.xlu0.b32.start.end [1/1] (short) (narrow) %v106_v0, 8  ;;  %89 = vst.msk [vmem:[#allocation2] sm:$0xff] %vm88_vm0, %v655_v19  ;;  %508 = vmatprep.subr.bf16.mxu0 %v655_v19  ;;  %vm656_vm1 = vmmov 0   ;;  %v534_v22 = vld [vmem:[#allocation8] sm:$0xff]   ;;  %v484_v23 = vld [vmem:[#allocation3] sm:$0xff]   ;;  %v500_v36 = vld [vmem:[#allocation3 + $0x10] sm:$0xff]  }
  0x33   :  { %v141_v2 = vshrl.u32 %v140_v1, 7  ;;  %516 = vmatprep.subr.bf16.mxu1 %v655_v19  ;;  %512 = vmatprep.mubr.msk.bf16.mxu0 %vm656_vm1, %v655_v19  ;;  %v486_v24 = vunpack.c.h.bf16 %v484_v23  ;;  %v499_v25 = vld [vmem:[#allocation3 + $0x8] sm:$0xff]   ;;  %v485_v26 = vunpack.c.l.bf16 %v484_v23  ;;  %v493_v42 = vunpack.c.l.bf16 %v500_v36  ;;  %v501_v52 = vld [vmem:[#allocation3 + $0x18] sm:$0xff]   ;;  %s657_s30 = smov [#allocation11]  }
  0x34   :  { %520 = vmatprep.mubr.msk.bf16.mxu1 %vm656_vm1, %v655_v19  ;;  %509 = vmatpush3.bf16.msra.mxu0 %v533_v21  ;;  %v489_v29 = vunpack.c.l.bf16 %v499_v25  ;;  %v490_v34 = vunpack.c.h.bf16 %v499_v25  ;;  %v494_v50 = vunpack.c.h.bf16 %v500_v36  ;;  %v497_v60 = vunpack.c.l.bf16 %v501_v52  ;;  %s462_s9 = sshll.u32 %s657_s30, 4  ;;  %s463_s9 = int_to_ptr.vmem [resolvable:$true] %s462_s9 }
  0x35   :  { %v149_v3 = vsub.s32 1, %v141_v2  ;;  %v142_v4 = vsub.s32 0, %v141_v2  ;;  %v156_v8 = vsub.s32 2, %v141_v2  ;;  %v163_v10 = vsub.s32 3, %v141_v2  ;;  %510 = vmatprep.subr.bf16.mxu0 %v655_v19  ;;  %p626_p7 = scmp.lt.s32.totalorder %s463_s9, %s463_s9 }
  0x36   :  { %v170_v12 = vsub.s32 4, %v141_v2  ;;  %v177_v14 = vsub.s32 5, %v141_v2  ;;  %v184_v16 = vsub.s32 6, %v141_v2  ;;  %v191_v18 = vsub.s32 7, %v141_v2 }
  0x37   :  { %vm269_vm2 = vcmask 1041409   ;;  %vm271_vm3 = vcmask 1042434   ;;  %vm273_vm4 = vcmask 1043459   ;;  %vm275_vm5 = vcmask 1044484  }
  0x38   :  { %511 = vmatpush3.bf16.msra.mxu0 %v534_v22  ;;  %vm277_vm6 = vcmask 1045509   ;;  %vm279_vm7 = vcmask 1046534   ;;  %vm281_vm8 = vcmask 1047559  }
  0xae   :  { %v123_v5 = vpop.trf.xlu0 }
  0xaf   :  { %v150_v6 = vrot.slane %v123_v5, %v149_v3  ;;  %v143_v7 = vrot.slane %v123_v5, %v142_v4  ;;  %v157_v9 = vrot.slane %v123_v5, %v156_v8  ;;  %v164_v11 = vrot.slane %v123_v5, %v163_v10 }
  0xb0   :  { %v171_v13 = vrot.slane %v123_v5, %v170_v12  ;;  %v178_v15 = vrot.slane %v123_v5, %v177_v14  ;;  %v185_v17 = vrot.slane %v123_v5, %v184_v16  ;;  %v192_v20 = vrot.slane %v123_v5, %v191_v18 }
  0xb1   :  { %152 = vbcast.lane.b32.xlu1 %v150_v6, 256  ;;  %145 = vbcast.lane.b32.xlu0 %v143_v7, 256  ;;  %v498_v7 = vunpack.c.h.bf16 %v501_v52 }
  0xb5   :  { %159 = vbcast.lane.b32.xlu1 %v157_v9, 256 }
  0xb9   :  { %166 = vbcast.lane.b32.xlu1 %v164_v11, 256 }
  0xbd   :  { %173 = vbcast.lane.b32.xlu1 %v171_v13, 256 }
  0xc1   :  { %180 = vbcast.lane.b32.xlu1 %v178_v15, 256 }
  0xc5   :  { %187 = vbcast.lane.b32.xlu1 %v185_v17, 256 }
  0xc9   :  { %194 = vbcast.lane.b32.xlu1 %v192_v20, 256 }
 0x123   :  { %v153_v27 = vpop.permute.xlu1 %152  ;;  %v146_v28 = vpop.permute.xlu0 %145 }
 0x124   :  { %v197_v30 = vmul.f32 %v486_v24, %v153_v27  ;;  %v196_v31 = vmul.f32 %v485_v26, %v146_v28 }
 0x126   :  { %v212_v35 = vsel %vm88_vm0, %v197_v30, 0.0  ;;  %v205_v37 = vsel %vm88_vm0, %v196_v31, 0.0 }
 0x127   :  { %v160_v32 = vpop.permute.xlu1 %159  ;;  %v213_v40 = vrot.slane %v212_v35, 4  ;;  %v206_v43 = vrot.slane %v205_v37, 4 }
 0x128   :  { %v198_v33 = vmul.f32 %v489_v29, %v160_v32 }
 0x129   :  { %v214_v48 = vadd.f32 %v213_v40, %v212_v35  ;;  %v207_v51 = vadd.f32 %v206_v43, %v205_v37 }
 0x12a   :  { %v219_v38 = vsel %vm88_vm0, %v198_v33, 0.0 }
 0x12b   :  { %v167_v39 = vpop.permute.xlu1 %166  ;;  %v220_v44 = vrot.slane %v219_v38, 4  ;;  %v215_v58 = vrot.slane %v214_v48, 2  ;;  %v208_v61 = vrot.slane %v207_v51, 2 }
 0x12c   :  { %v199_v41 = vmul.f32 %v490_v34, %v167_v39 }
 0x12d   :  { %v221_v53 = vadd.f32 %v220_v44, %v219_v38  ;;  %v216_v4 = vadd.f32 %v215_v58, %v214_v48  ;;  %v209_v8 = vadd.f32 %v208_v61, %v207_v51 }
 0x12e   :  { %v226_v45 = vsel %vm88_vm0, %v199_v41, 0.0 }
 0x12f   :  { %v227_v46 = vrot.slane %v226_v45, 4  ;;  %v174_v47 = vpop.permute.xlu1 %173  ;;  %v222_v63 = vrot.slane %v221_v53, 2  ;;  %v217_v16 = vrot.slane %v216_v4, 1  ;;  %v210_v20 = vrot.slane %v209_v8, 1 }
 0x130   :  { %v200_v49 = vmul.f32 %v493_v42, %v174_v47 }
 0x131   :  { %v228_v55 = vadd.f32 %v227_v46, %v226_v45  ;;  %v223_v10 = vadd.f32 %v222_v63, %v221_v53  ;;  %v218_v28 = vadd.f32 %v217_v16, %v216_v4  ;;  %v211_v30 = vadd.f32 %v210_v20, %v209_v8  ;;  %v535_v4 = vld [vmem:[#allocation9 + $0x8] sm:$0xff]  }
 0x132   :  { %v233_v54 = vsel %vm88_vm0, %v200_v49, 0.0  ;;  %v139_v49 = vld [vmem:[#allocation2] sm:$0xff]  ;;  %517 = vmatpush3.bf16.msra.mxu1 %v535_v4 }
 0x133   :  { %v234_v56 = vrot.slane %v233_v54, 4  ;;  %v181_v57 = vpop.permute.xlu1 %180  ;;  %v229_v1 = vrot.slane %v228_v55, 2  ;;  %v224_v23 = vrot.slane %v223_v10, 1  ;;  %v270_v39 = vsel %vm269_vm2, %v218_v28, %v211_v30  ;;  %518 = vmatprep.subr.bf16.mxu1 %v655_v19  ;;  %v479_v19 = vld [vmem:[%s759_s7] ss:$0 sm:$0xff] }
 0x134   :  { %v201_v59 = vmul.f32 %v494_v50, %v181_v57 }
 0x135   :  { %v235_v62 = vadd.f32 %v234_v56, %v233_v54  ;;  %v230_v12 = vadd.f32 %v229_v1, %v228_v55  ;;  %v225_v34 = vadd.f32 %v224_v23, %v223_v10  ;;  %v473_v55 = vld [vmem:[%s755_s3] ss:$0 sm:$0xff] }
 0x136   :  { %v240_v0 = vsel %vm88_vm0, %v201_v59, 0.0  ;;  %v477_v10 = vld [vmem:[%s756_s4] ss:$0 sm:$0xff]  ;;  %s621_s4 = scalar_lea.vmem %s463_s9, 128 }
 0x137   :  { %v241_v2 = vrot.slane %v240_v0, 4  ;;  %v188_v3 = vpop.permute.xlu1 %187  ;;  %v236_v5 = vrot.slane %v235_v62, 2  ;;  %v231_v25 = vrot.slane %v230_v12, 1  ;;  %v272_v42 = vsel %vm271_vm3, %v225_v34, %v270_v39  ;;  %p622_p6 = scmp.ne.s32.totalorder %s463_s9, %s621_s4  ;;  %p627_p8 = scmp.lt.s32.totalorder %s621_s4, %s621_s4 }
 0x138   :  { %v202_v6 = vmul.f32 %v497_v60, %v188_v3 }
 0x139   :  { %v242_v9 = vadd.f32 %v241_v2, %v240_v0  ;;  %v237_v17 = vadd.f32 %v236_v5, %v235_v62  ;;  %v232_v35 = vadd.f32 %v231_v25, %v230_v12  ;;  %v536_v5 = vld [vmem:[#allocation9] sm:$0xff]   ;;  %p628_p9 = por %p627_p8, %p626_p7 }
 0x13a   :  { %v247_v11 = vsel %vm88_vm0, %v202_v6, 0.0  ;;  %519 = vmatpush3.bf16.msra.mxu1 %v536_v5  ;;  %v478_v12 = vld [vmem:[%s757_s5] ss:$0 sm:$0xff] }
 0x13b   :  { %v243_v13 = vrot.slane %v242_v9, 2  ;;  %v248_v14 = vrot.slane %v247_v11, 4  ;;  %v195_v15 = vpop.permute.xlu1 %194  ;;  %v238_v29 = vrot.slane %v237_v17, 1  ;;  %v274_v44 = vsel %vm273_vm4, %v232_v35, %v272_v42  ;;  %p629_p10 = pnand %p628_p9, %p622_p6 }
 0x13c   :  { %v203_v18 = vmul.f32 %v498_v7, %v195_v15 }
 0x13d   :  { %v244_v21 = vadd.f32 %v243_v13, %v242_v9  ;;  %v249_v22 = vadd.f32 %v248_v14, %v247_v11  ;;  %v239_v38 = vadd.f32 %v238_v29, %v237_v17 }
 0x13e   :  { %v254_v24 = vsel %vm88_vm0, %v203_v18, 0.0 }
 0x13f   :  { %v250_v26 = vrot.slane %v249_v22, 2  ;;  %v255_v27 = vrot.slane %v254_v24, 4  ;;  %v245_v31 = vrot.slane %v244_v21, 1  ;;  %v276_v46 = vsel %vm275_vm5, %v239_v38, %v274_v44 }
 0x141   :  { %v251_v32 = vadd.f32 %v250_v26, %v249_v22  ;;  %v256_v33 = vadd.f32 %v255_v27, %v254_v24  ;;  %v246_v40 = vadd.f32 %v245_v31, %v244_v21 }
 0x143   :  { %v252_v36 = vrot.slane %v251_v32, 1  ;;  %v257_v37 = vrot.slane %v256_v33, 2  ;;  %v278_v47 = vsel %vm277_vm6, %v246_v40, %v276_v46 }
 0x145   :  { %v258_v41 = vadd.f32 %v257_v37, %v256_v33  ;;  %v253_v43 = vadd.f32 %v252_v36, %v251_v32 }
 0x147   :  { %v259_v45 = vrot.slane %v258_v41, 1  ;;  %v280_v50 = vsel %vm279_vm7, %v253_v43, %v278_v47 }
 0x149   :  { %v260_v48 = vadd.f32 %v259_v45, %v258_v41 }
 0x14b   :  { %v282_v51 = vsel %vm281_vm8, %v260_v48, %v280_v50 }
 0x14c   :  { %v284_v52 = vadd.f32 %v282_v51, %v139_v49 }
 0x14e   :  { %285 = vst.msk [vmem:[#allocation2] sm:$0xff] %vm88_vm0, %v284_v52 }
 0x155   :  { %v289_v53 = vld [vmem:[#allocation2] sm:$0xff] }
 0x156   :  { %v290_v54 = vpack.c.bf16 %v289_v53, %v289_v53 }
 0x158   :  { %513 = vmatmul.mubr.msk.bf16.vlgmr.msra.gmra.mxu0 %vm88_vm0, %v290_v54 }
 0x218   :  { %v351_v56 = vpop.f32.mrf.mxu0 }
 0x219   :  { %v352_v57 = vadd.f32 %v473_v55, %v351_v56 }
 0x21a   :  { %v514_v58 = vpop.f32.mrf.mxu0 }
 0x21b   :  { %537 = vtanh.f32 %v352_v57 }
 0x21c   :  { %v354_v59 = vpop.f32.mrf.mxu0 }
 0x21e   :  { %v515_v60 = vpop.f32.mrf.mxu0 }
 0x228   :  { %v538_v61 = vpop.eup %537 }
 0x229   :  { %v358_v62 = vsel %vm88_vm0, %v538_v61, 0.0 }
 0x22a   :  { %359 = vadd.xlane.f32.xlu1 %v358_v62 }
 0x2b3   :  { %v360_v63 = vpop.xlane.xlu1 %359 }
 0x2b4   :  { %v362_v0 = vmul.f32 0.03125, %v360_v63 }
 0x2b6   :  { %v363_v1 = vsub.f32 %v538_v61, %v362_v0 }
 0x2b8   :  { %v364_v2 = vmul.f32 %v363_v1, %v363_v1 }
 0x2ba   :  { %v365_v3 = vsel %vm88_vm0, %v364_v2, 0.0 }
 0x2bb   :  { %366 = vadd.xlane.f32.xlu0 %v365_v3 }
 0x344   :  { %v367_v6 = vpop.xlane.xlu0 %366 }
 0x345   :  { %v368_v7 = vmul.f32 0.03125, %v367_v6 }
 0x347   :  { %v369_v8 = vadd.f32 1e-05, %v368_v7 }
 0x349   :  { %539 = vrsqrt.f32 %v369_v8 }
 0x356   :  { %v540_v9 = vpop.eup %539 }
 0x357   :  { %v371_v11 = vmul.f32 %v540_v9, %v363_v1 }
 0x359   :  { %v379_v13 = vmul.f32 %v477_v10, %v371_v11 }
 0x35b   :  { %v387_v14 = vadd.f32 %v478_v12, %v379_v13 }
 0x35d   :  { %v388_v15 = vpack.c.bf16 %v387_v14, %v387_v14 }
 0x35f   :  { %521 = vmatmul.mubr.msk.bf16.vlgmr.msra.gmra.mxu1 %vm88_vm0, %v388_v15 }
 0x41f   :  { %v449_v16 = vpop.f32.mrf.mxu1 }
 0x420   :  { %v450_v17 = vadd.f32 %v479_v19, %v449_v16 }
 0x421   :  { %v522_v18 = vpop.f32.mrf.mxu1 }
 0x422   :  { %455 = vst.msk [vmem:[#allocation11] sm:$0xff] %vm88_vm0, %v450_v17 }
 0x423   :  { %v452_v20 = vpop.f32.mrf.mxu1 }
 0x424   :  { %632 = shalt.err (!%p629_p10)
}
 0x425   :  { %465 = dma.vmem_to_hbm [thread:$0]  %s463_s9, 128, %s760_s8, [#allocation5]   ;;  %v523_v21 = vpop.f32.mrf.mxu1 }
 0x426   :  { %647 = dma.done.wait [#allocation5], 128  }
 0x427   :  { %648 = vsyncadd [#allocation5], 4294967168 }
 0x428   :  { %469 = vsyncpa [#allocation4], 1 }
 0x429   :  { %470 = vsyncpa [#allocation7], 1 }
 0x42a   :  { %471 = vsyncpa [#allocation10], 1 }
 0x42b   :  { %472 = vsyncpa [#allocation5], 1 }

</bundles_post_ra>
